<compile_context>
chip_gen: v5e
topology: v5e:2x2
jax: 0.10.0
libtpu: 0.0.40
codegen_flags: <defaults>
</compile_context>

<pallas_src>
import math
import functools

import jax
import jax.numpy as jnp
from jax import lax
from jax.experimental import pallas as pl
from jax.experimental.pallas import tpu as pltpu

_VMEM_LIMIT = 64 * 1024 * 1024


def _pick_tile(n, candidates):
    """Largest candidate tile that evenly divides n (falls back to n)."""
    for c in candidates:
        if c <= n and n % c == 0:
            return c
    return n


# ---------------------------------------------------------------------------
# Kernel 1: fused QKV projection  [q|k|v] = x @ Wqkv + bqkv  (bf16 MXU, f32 acc)
# Three dots against column slices of W, each result cast/stored immediately
# so the peak live f32 intermediate is (TM, H), not (TM, 3H).
# ---------------------------------------------------------------------------
def _qkv_proj_kernel(x_ref, w_ref, b_ref, q_ref, k_ref, v_ref, *, hidden):
    x = x_ref[...]                                           # (TM, H) bf16
    for idx, out in enumerate((q_ref, k_ref, v_ref)):
        sl = slice(idx * hidden, (idx + 1) * hidden)
        y = jnp.dot(x, w_ref[:, sl], preferred_element_type=jnp.float32)
        out[...] = (y + b_ref[:, sl]).astype(out.dtype)


def qkv_projection(x, w, b, hidden):
    """x: (M, H) bf16, w: (H, 3H) bf16, b: (1, 3H) f32 -> 3x (M, H) bf16."""
    M, H = x.shape
    TM = _pick_tile(M, (256, 128, 64, 32, 16, 8))
    grid = (M // TM,)
    out_sds = jax.ShapeDtypeStruct((M, hidden), jnp.bfloat16)
    flops = 2 * M * H * 3 * hidden
    bytes_accessed = (M * H * 2 + H * 3 * hidden * 2 + 3 * hidden * 4
                      + 3 * M * hidden * 2)
    return pl.pallas_call(
        functools.partial(_qkv_proj_kernel, hidden=hidden),
        out_shape=(out_sds, out_sds, out_sds),
        grid=grid,
        in_specs=[
            pl.BlockSpec((TM, H), lambda i: (i, 0)),
            pl.BlockSpec((H, 3 * hidden), lambda i: (0, 0)),
            pl.BlockSpec((1, 3 * hidden), lambda i: (0, 0)),
        ],
        out_specs=(
            pl.BlockSpec((TM, hidden), lambda i: (i, 0)),
            pl.BlockSpec((TM, hidden), lambda i: (i, 0)),
            pl.BlockSpec((TM, hidden), lambda i: (i, 0)),
        ),
        compiler_params=pltpu.CompilerParams(
            dimension_semantics=("parallel",),
            vmem_limit_bytes=_VMEM_LIMIT),
        cost_estimate=pl.CostEstimate(
            flops=flops, transcendentals=0, bytes_accessed=bytes_accessed),
    )(x, w, b)


# ---------------------------------------------------------------------------
# Kernel 2: flash-style attention.
#   * heads split via static lane slices of H
#   * per-head running stats on a LEADING scratch axis (pure address offsets)
#   * single lane-dense (TQ, H) bf16 store per Q tile in the epilogue
# ---------------------------------------------------------------------------
def _flash_attn_kernel(q_ref, k_ref, v_ref, mask_ref, o_ref,
                       m_sc, l_sc, acc_sc, *, num_heads, head_dim):
    ki = pl.program_id(2)
    n_kv = pl.num_programs(2)

    @pl.when(ki == 0)
    def _():
        m_sc[...] = jnp.full(m_sc.shape, -jnp.inf, jnp.float32)
        l_sc[...] = jnp.zeros(l_sc.shape, jnp.float32)
        acc_sc[...] = jnp.zeros(acc_sc.shape, jnp.float32)

    q = q_ref[0]            # (TQ, H) bf16 ; 1/sqrt(d) folded into query weights
    k = k_ref[0]            # (TK, H) bf16
    v = v_ref[0]            # (TK, H) bf16
    mask = mask_ref[0, 0]   # (1, TK) f32 additive mask, broadcast over rows

    for h in range(num_heads):
        sl = slice(h * head_dim, (h + 1) * head_dim)
        q_h, k_h, v_h = q[:, sl], k[:, sl], v[:, sl]

        # QK^T via dot_general contracting the head dim (MXU NT path,
        # no transposed-K copy).
        s = lax.dot_general(q_h, k_h, (((1,), (1,)), ((), ())),
                            preferred_element_type=jnp.float32)       # (TQ, TK)
        s = s + mask

        m_prev = m_sc[h]                                               # (TQ, 1)
        m_new = jnp.maximum(m_prev, jnp.max(s, axis=-1, keepdims=True))
        alpha = jnp.exp(m_prev - m_new)
        # NOTE: assumes finite additive mask (BERT uses -10000, not -inf).
        p = jnp.exp(s - m_new)                                         # (TQ, TK) f32
        l_sc[h] = alpha * l_sc[h] + jnp.sum(p, axis=-1, keepdims=True)
        acc_sc[h] = alpha * acc_sc[h] + jnp.dot(
            p.astype(v_h.dtype), v_h, preferred_element_type=jnp.float32)
        m_sc[h] = m_new

    @pl.when(ki == n_kv - 1)
    def _():
        # One full-width lane-dense store (no per-head masked partial stores).
        outs = []
        for h in range(num_heads):
            inv_l = pl.reciprocal(l_sc[h], approx=True)                # EUP, ~free
            outs.append(acc_sc[h] * inv_l)                             # (TQ, d) f32
        o_ref[0] = jnp.concatenate(outs, axis=-1).astype(o_ref.dtype)  # (TQ, H)


def flash_attention(q, k, v, mask, num_heads):
    """q/k/v: (B, S, H) bf16; mask: (B, 1, 1, S) f32 -> context (B, S, H) bf16."""
    B, S, H = q.shape
    d = H // num_heads
    TQ = _pick_tile(S, (128, 64, 32, 16, 8))        # keep >=128 when possible
    TK = _pick_tile(S, (512, 256, 128, 64, 32, 16, 8))
    n_q = S // TQ
    grid = (B, n_q, S // TK)
    kern = functools.partial(_flash_attn_kernel, num_heads=num_heads, head_dim=d)
    flops = 4 * B * num_heads * S * S * d
    # K/V (and the mask) are re-read once per query tile.
    bytes_accessed = (B * S * H * 2                     # Q
                      + 2 * B * S * H * 2 * n_q         # K, V re-read per Q tile
                      + B * S * 4 * n_q                  # mask re-read per Q tile
                      + B * S * H * 2)                   # bf16 output
    return pl.pallas_call(
        kern,
        out_shape=jax.ShapeDtypeStruct((B, S, H), jnp.bfloat16),
        grid=grid,
        in_specs=[
            pl.BlockSpec((1, TQ, H), lambda b, qi, ki: (b, qi, 0)),
            pl.BlockSpec((1, TK, H), lambda b, qi, ki: (b, ki, 0)),
            pl.BlockSpec((1, TK, H), lambda b, qi, ki: (b, ki, 0)),
            pl.BlockSpec((1, 1, 1, TK), lambda b, qi, ki: (b, 0, 0, ki)),
        ],
        out_specs=pl.BlockSpec((1, TQ, H), lambda b, qi, ki: (b, qi, 0)),
        scratch_shapes=[
            pltpu.VMEM((num_heads, TQ, 1), jnp.float32),   # running max m
            pltpu.VMEM((num_heads, TQ, 1), jnp.float32),   # running denom l
            pltpu.VMEM((num_heads, TQ, d), jnp.float32),   # running numerator
        ],
        compiler_params=pltpu.CompilerParams(
            dimension_semantics=("parallel", "parallel", "arbitrary"),
            vmem_limit_bytes=_VMEM_LIMIT),
        cost_estimate=pl.CostEstimate(
            flops=flops, transcendentals=B * num_heads * S * S,
            bytes_accessed=bytes_accessed),
    )(q, k, v, mask)


# ---------------------------------------------------------------------------
# Module wrapper (only free reshapes / param prep outside the kernels)
# ---------------------------------------------------------------------------
def bert_self_attention(hidden_states, params, attention_mask, num_heads):
    B, S, H = hidden_states.shape
    d = H // num_heads
    scale = 1.0 / math.sqrt(d)

    # Fuse QKV weights; fold the 1/sqrt(d) attention scale into the query proj.
    wqkv = jnp.concatenate(
        [params["wq"] * scale, params["wk"], params["wv"]], axis=1
    ).astype(jnp.bfloat16)                                   # (H, 3H)
    bqkv = jnp.concatenate(
        [params["bq"] * scale, params["bk"], params["bv"]], axis=1
    ).astype(jnp.float32)                                    # (1, 3H)

    x2d = hidden_states.reshape(B * S, H).astype(jnp.bfloat16)
    q2d, k2d, v2d = qkv_projection(x2d, wqkv, bqkv, H)

    # Free reshapes (no transpose, no HBM copy): heads are split inside the
    # attention kernel via static lane slices of the H dimension.
    q = q2d.reshape(B, S, H)
    k = k2d.reshape(B, S, H)
    v = v2d.reshape(B, S, H)

    if attention_mask is None:
        attention_mask = jnp.zeros((B, 1, 1, S), jnp.float32)
    attention_mask = attention_mask.astype(jnp.float32)

    return flash_attention(q, k, v, attention_mask, num_heads)  # (B, S, H) bf16


# Pure-JAX reference for a sanity check (f32 everywhere, matches PyTorch math).
def bert_self_attention_ref(hidden_states, params, attention_mask, num_heads):
    B, S, H = hidden_states.shape
    d = H // num_heads
    q = hidden_states @ params["wq"] + params["bq"]
    k = hidden_states @ params["wk"] + params["bk"]
    v = hidden_states @ params["wv"] + params["bv"]

    def split(t):
        return t.reshape(B, S, num_heads, d).transpose(0, 2, 1, 3)

    q, k, v = split(q), split(k), split(v)
    scores = jnp.einsum("bhqd,bhkd->bhqk", q, k) / math.sqrt(d)
    if attention_mask is not None:
        scores = scores + attention_mask
    probs = jax.nn.softmax(scores, axis=-1)
    ctx = jnp.einsum("bhqk,bhkd->bhqd", probs, v)
    return ctx.transpose(0, 2, 1, 3).reshape(B, S, H)


if __name__ == "__main__":
    # config: hidden_size=32, num_attention_heads=4, seq=8, batch=2
    B, S, H, nH = 2, 8, 32, 4

    key = jax.random.PRNGKey(0)
    k_x, k_wq, k_wk, k_wv, k_bq, k_bk, k_bv = jax.random.split(key, 7)

    hidden_states = jax.random.normal(k_x, (B, S, H), jnp.float32)

    # nn.Linear(H, H) weights, stored pre-transposed to (H_in, H_out)
    params = {
        "wq": jax.random.normal(k_wq, (H, H), jnp.float32) * 0.02,
        "wk": jax.random.normal(k_wk, (H, H), jnp.float32) * 0.02,
        "wv": jax.random.normal(k_wv, (H, H), jnp.float32) * 0.02,
        "bq": jax.random.normal(k_bq, (1, H), jnp.float32) * 0.02,
        "bk": jax.random.normal(k_bk, (1, H), jnp.float32) * 0.02,
        "bv": jax.random.normal(k_bv, (1, H), jnp.float32) * 0.02,
    }

    # BERT-style additive mask (B, 1, 1, S): 0 for valid tokens, -10000 for pad.
    valid = jnp.ones((B, S), jnp.float32).at[1, S - 2:].set(0.0)
    attention_mask = ((1.0 - valid) * -10000.0)[:, None, None, :]

    out = bert_self_attention(hidden_states, params, attention_mask, nH)
    out = jax.block_until_ready(out)

    ref = bert_self_attention_ref(hidden_states, params, attention_mask, nH)
    assert out.shape == (B, S, H)
    assert jnp.allclose(out.astype(jnp.float32), ref, atol=5e-2, rtol=5e-2), float(
        jnp.max(jnp.abs(out.astype(jnp.float32) - ref)))

    print("KERNEL_OK")
</pallas_src>

<mosaic_0001>
module attributes {stable_mosaic.version = 11 : i64} {
  func.func @_qkv_proj_kernel(%arg0: i32, %arg1: memref<16x32xbf16, #tpu.memory_space<vmem>>, %arg2: memref<32x96xbf16, #tpu.memory_space<vmem>>, %arg3: memref<1x96xf32, #tpu.memory_space<vmem>>, %arg4: memref<16x32xbf16, #tpu.memory_space<vmem>>, %arg5: memref<16x32xbf16, #tpu.memory_space<vmem>>, %arg6: memref<16x32xbf16, #tpu.memory_space<vmem>>) attributes {dimension_semantics = [#tpu.dimension_semantics<parallel>], iteration_bounds = array<i64: 1>, scalar_prefetch = 0 : i64, scratch_operands = 0 : i64, tpu.core_type = #tpu.core_type<tc>, window_params = [{transform_indices = @transform_0, window_bounds = array<i64: 16, 32>}, {pipeline_mode = #tpu.pipeline_mode<synchronous>, transform_indices = @transform_1, window_bounds = array<i64: 32, 96>}, {pipeline_mode = #tpu.pipeline_mode<synchronous>, transform_indices = @transform_2, window_bounds = array<i64: 1, 96>}, {transform_indices = @transform_3, window_bounds = array<i64: 16, 32>}, {transform_indices = @transform_4, window_bounds = array<i64: 16, 32>}, {transform_indices = @transform_5, window_bounds = array<i64: 16, 32>}]} {
    %c0 = arith.constant 0 : index
    %c0_0 = arith.constant 0 : index
    %0 = vector.load %arg1[%c0, %c0_0] : memref<16x32xbf16, #tpu.memory_space<vmem>>, vector<16x32xbf16>
    %c0_1 = arith.constant 0 : index
    %c0_2 = arith.constant 0 : index
    %1 = vector.load %arg2[%c0_1, %c0_2] : memref<32x96xbf16, #tpu.memory_space<vmem>>, vector<32x32xbf16>
    %cst = arith.constant dense<0.000000e+00> : vector<16x32xf32>
    %2 = tpu.matmul %0, %1, %cst {dimension_numbers = #tpu.dot_dimension_numbers<[1], [0], [0], [1], [0, 0, 1, 1], [], []>} : vector<16x32xbf16>, vector<32x32xbf16>, vector<16x32xf32> -> vector<16x32xf32>
    %c0_3 = arith.constant 0 : index
    %c0_4 = arith.constant 0 : index
    %3 = vector.load %arg3[%c0_3, %c0_4] : memref<1x96xf32, #tpu.memory_space<vmem>>, vector<1x32xf32>
    %4 = vector.broadcast %3 : vector<1x32xf32> to vector<16x32xf32>
    %5 = arith.addf %2, %4 : vector<16x32xf32>
    %6 = arith.truncf %5 : vector<16x32xf32> to vector<16x32xbf16>
    %c0_5 = arith.constant 0 : index
    %c0_6 = arith.constant 0 : index
    %7 = vector.load %arg4[%c0_5, %c0_6] : memref<16x32xbf16, #tpu.memory_space<vmem>>, vector<16x32xbf16>
    tpu.vector_store %arg4[%c0_5, %c0_6], %6 {strides = array<i32>} : memref<16x32xbf16, #tpu.memory_space<vmem>>, vector<16x32xbf16>,
    %c0_7 = arith.constant 0 : index
    %c32 = arith.constant 32 : index
    %8 = vector.load %arg2[%c0_7, %c32] : memref<32x96xbf16, #tpu.memory_space<vmem>>, vector<32x32xbf16>
    %cst_8 = arith.constant dense<0.000000e+00> : vector<16x32xf32>
    %9 = tpu.matmul %0, %8, %cst_8 {dimension_numbers = #tpu.dot_dimension_numbers<[1], [0], [0], [1], [0, 0, 1, 1], [], []>} : vector<16x32xbf16>, vector<32x32xbf16>, vector<16x32xf32> -> vector<16x32xf32>
    %c0_9 = arith.constant 0 : index
    %c32_10 = arith.constant 32 : index
    %10 = vector.load %arg3[%c0_9, %c32_10] : memref<1x96xf32, #tpu.memory_space<vmem>>, vector<1x32xf32>
    %11 = vector.broadcast %10 : vector<1x32xf32> to vector<16x32xf32>
    %12 = arith.addf %9, %11 : vector<16x32xf32>
    %13 = arith.truncf %12 : vector<16x32xf32> to vector<16x32xbf16>
    %c0_11 = arith.constant 0 : index
    %c0_12 = arith.constant 0 : index
    %14 = vector.load %arg5[%c0_11, %c0_12] : memref<16x32xbf16, #tpu.memory_space<vmem>>, vector<16x32xbf16>
    tpu.vector_store %arg5[%c0_11, %c0_12], %13 {strides = array<i32>} : memref<16x32xbf16, #tpu.memory_space<vmem>>, vector<16x32xbf16>,
    %c0_13 = arith.constant 0 : index
    %c64 = arith.constant 64 : index
    %15 = vector.load %arg2[%c0_13, %c64] : memref<32x96xbf16, #tpu.memory_space<vmem>>, vector<32x32xbf16>
    %cst_14 = arith.constant dense<0.000000e+00> : vector<16x32xf32>
    %16 = tpu.matmul %0, %15, %cst_14 {dimension_numbers = #tpu.dot_dimension_numbers<[1], [0], [0], [1], [0, 0, 1, 1], [], []>} : vector<16x32xbf16>, vector<32x32xbf16>, vector<16x32xf32> -> vector<16x32xf32>
    %c0_15 = arith.constant 0 : index
    %c64_16 = arith.constant 64 : index
    %17 = vector.load %arg3[%c0_15, %c64_16] : memref<1x96xf32, #tpu.memory_space<vmem>>, vector<1x32xf32>
    %18 = vector.broadcast %17 : vector<1x32xf32> to vector<16x32xf32>
    %19 = arith.addf %16, %18 : vector<16x32xf32>
    %20 = arith.truncf %19 : vector<16x32xf32> to vector<16x32xbf16>
    %c0_17 = arith.constant 0 : index
    %c0_18 = arith.constant 0 : index
    %21 = vector.load %arg6[%c0_17, %c0_18] : memref<16x32xbf16, #tpu.memory_space<vmem>>, vector<16x32xbf16>
    tpu.vector_store %arg6[%c0_17, %c0_18], %20 {strides = array<i32>} : memref<16x32xbf16, #tpu.memory_space<vmem>>, vector<16x32xbf16>,
    return
  }
  func.func @transform_0(%arg0: i32) -> (i32, i32) {
    %c0_i32 = arith.constant 0 : i32
    %c0_i32_0 = arith.constant 0 : i32
    return %arg0, %c0_i32 : i32, i32
  }
  func.func @transform_1(%arg0: i32) -> (i32, i32) {
    %c0_i32 = arith.constant 0 : i32
    %c0_i32_0 = arith.constant 0 : i32
    %c0_i32_1 = arith.constant 0 : i32
    return %c0_i32, %c0_i32_0 : i32, i32
  }
  func.func @transform_2(%arg0: i32) -> (i32, i32) {
    %c0_i32 = arith.constant 0 : i32
    %c0_i32_0 = arith.constant 0 : i32
    %c0_i32_1 = arith.constant 0 : i32
    return %c0_i32, %c0_i32_0 : i32, i32
  }
  func.func @transform_3(%arg0: i32) -> (i32, i32) {
    %c0_i32 = arith.constant 0 : i32
    %c0_i32_0 = arith.constant 0 : i32
    return %arg0, %c0_i32 : i32, i32
  }
  func.func @transform_4(%arg0: i32) -> (i32, i32) {
    %c0_i32 = arith.constant 0 : i32
    %c0_i32_0 = arith.constant 0 : i32
    return %arg0, %c0_i32 : i32, i32
  }
  func.func @transform_5(%arg0: i32) -> (i32, i32) {
    %c0_i32 = arith.constant 0 : i32
    %c0_i32_0 = arith.constant 0 : i32
    return %arg0, %c0_i32 : i32, i32
  }
}

</mosaic_0001>

<bundles_post_ra>
// kernel: tpu_custom_call.1
= control target key start
LH: loop header
LB: loop body
LE: loop exit
PB: predicated region body
PF: predicated region fallthrough
CT: control target
= control target key end

     0   :  { %11 = vsyncpa [#allocation3], 0  ;;  %s508_s0 = inlined_call_operand.hbm [shape: bf16[16,32], index: 0, kind: input, shape index: {}]   ;;  %s509_s1 = inlined_call_operand.hbm [shape: bf16[32,96], index: 1, kind: input, shape index: {}]   ;;  %s510_s2 = inlined_call_operand.vmem [shape: f32[1,96], index: 2, kind: input, shape index: {}]   ;;  %s511_s3 = inlined_call_operand.hbm [shape: bf16[16,32], index: 3, kind: output, shape index: {0}]   ;;  %s512_s4 = inlined_call_operand.hbm [shape: bf16[16,32], index: 4, kind: output, shape index: {1}]   ;;  %s513_s5 = inlined_call_operand.hbm [shape: bf16[16,32], index: 5, kind: output, shape index: {2}]  }
   0x1   :  { %12 = vsyncpa [#allocation6], 0 }
   0x2   :  { %13 = vsyncpa [#allocation4], 0 }
   0x3   :  { %14 = vsyncpa [#allocation9], 0  ;;  %s19_s20 = sshll.u32 %s508_s0, 4  ;;  %s422_s21 = smov [#allocation2]   ;;  %s20_s20 = int_to_ptr.hbm [resolvable:$true] %s19_s20 }
   0x4   :  { %s21_s22 = sshll.u32 %s422_s21, 4  ;;  %s32_s25 = sshll.u32 %s509_s1, 4  ;;  %s22_s22 = int_to_ptr.vmem [resolvable:$true] %s21_s22  ;;  %s33_s25 = int_to_ptr.hbm [resolvable:$true] %s32_s25 }
   0x5   :  { %s423_s26 = smov 64   ;;  %s424_s27 = smov 4  }
   0x6   :  { %27 = dma.hbm_to_vmem [thread:$0]  %s20_s20, 128, %s22_s22, [#allocation3], %s423_s26, %s423_s26, %s424_s27  }
   0x7   :  { %s425_s28 = smov [#allocation5]  }
   0x8   :  { %s34_s29 = sshll.u32 %s425_s28, 4  ;;  %s35_s29 = int_to_ptr.vmem [resolvable:$true] %s34_s29 }
   0x9   :  { %40 = dma.hbm_to_vmem [thread:$0]  %s33_s25, 256, %s35_s29, [#allocation6], %s423_s26, %s423_s26, %s424_s27  }
   0xa   :  { %414 = dma.done.wait [#allocation3], 128  }
   0xb   :  { %415 = vsyncadd [#allocation3], 4294967168 }
   0xc   :  { %416 = dma.done.wait [#allocation6], 256  }
   0xd   :  { %417 = vsyncadd [#allocation6], 4294967040  ;;  %v282_v0 = vld [vmem:[#allocation5 + $0x8] sm:$0xff]  ;;  %s426_s0 = smov 96   ;;  %v281_v2 = vld [vmem:[#allocation5] sm:$0xff]  ;;  %vm79_vm0 = vcmask 261120  }
   0xe   :  { %v280_v1 = vld [vmem:[#allocation5 + $0x8] sm:$0xff]  ;;  %165 = vrot.lane.b32.xlu0 %v282_v0, %s423_s26  ;;  %v279_v3 = vld [vmem:[#allocation5] sm:$0xff]  ;;  %v276_v6 = vld [vmem:[#allocation2] sm:$0xff]  ;;  %vm99_vm1 = vcmask 257024   ;;  %s427_s10 = smov [#allocation7]   ;;  %s196_s14 = sshll.u32 %s511_s3, 4  ;;  %s197_s14 = int_to_ptr.hbm [resolvable:$true] %s196_s14 }
   0xf   :  { %121 = vrot.lane.b32.xlu1 %v280_v1, %s426_s0  ;;  %v278_v4 = vld [vmem:[#allocation5 + $0x8] sm:$0xff]  ;;  %v277_v5 = vld [vmem:[#allocation5] sm:$0xff]  ;;  %v291_v7 = vld [vmem:[%s510_s2] ss:$0 sm:$0xff]  ;;  %s194_s11 = sshll.u32 %s427_s10, 4  ;;  %s209_s17 = sshll.u32 %s512_s4, 4  ;;  %s195_s11 = int_to_ptr.vmem [resolvable:$true] %s194_s11  ;;  %s210_s17 = int_to_ptr.hbm [resolvable:$true] %s209_s17 }
  0x10   :  { %89 = vmatpush.bf16.msra.mxu0 %v278_v4  ;;  %125 = vrot.lane.b32.xlu2 %v291_v7, %s426_s0  ;;  %v292_v8 = vld [vmem:[%s510_s2] ss:$0 sm:$0xff]  ;;  %s429_s18 = smov [#allocation10]   ;;  %s222_s22 = sshll.u32 %s513_s5, 4  ;;  %s223_s22 = int_to_ptr.hbm [resolvable:$true] %s222_s22 }
  0x11   :  { %v293_v13 = vld [vmem:[%s510_s2] ss:$0 sm:$0xff]  ;;  %s428_s2 = smov [#allocation8]   ;;  %s220_s19 = sshll.u32 %s429_s18, 4  ;;  %s221_s19 = int_to_ptr.vmem [resolvable:$true] %s220_s19 }
  0x12   :  { %s207_s3 = sshll.u32 %s428_s2, 4  ;;  %s208_s3 = int_to_ptr.vmem [resolvable:$true] %s207_s3 }
  0x14   :  { %90 = vmatpush.bf16.msra.mxu0 %v277_v5 }
  0x16   :  { %163 = vrot.lane.b32.xlu0 %v281_v2, %s423_s26 }
  0x17   :  { %119 = vrot.lane.b32.xlu1 %v279_v3, %s426_s0  ;;  %257 = vmatmul.msk.bf16.vlgmr.msra.gmra.mxu0 %vm79_vm0, %v276_v6 }
  0x18   :  { %169 = vrot.lane.b32.xlu2 %v292_v8, %s423_s26 }
  0x6a   :  { %v126_v20 = vpop.permute.xlu2 %125 }
  0x72   :  { %v170_v24 = vpop.permute.xlu2 %169 }
  0x80   :  { %v166_v9 = vpop.permute.xlu0 %165 }
  0x81   :  { %v122_v10 = vpop.permute.xlu1 %121  ;;  %178 = vmatpush.bf16.msra.mxu2 %v166_v9 }
  0x82   :  { %134 = vmatpush.bf16.msra.mxu1 %v122_v10 }
  0x88   :  { %v164_v11 = vpop.permute.xlu0 %163 }
  0x89   :  { %v120_v12 = vpop.permute.xlu1 %119  ;;  %179 = vmatpush.bf16.msra.mxu2 %v164_v11 }
  0x8a   :  { %135 = vmatpush.bf16.msra.mxu1 %v120_v12 }
  0x8c   :  { %275 = vmatmul.msk.bf16.vlgmr.msra.gmra.mxu2 %vm79_vm0, %v276_v6 }
  0x8d   :  { %266 = vmatmul.msk.bf16.vlgmr.msra.gmra.mxu1 %vm79_vm0, %v276_v6 }
  0x94   :  { %v92_v14 = vpop.f32.mrf.mxu0 }
  0x95   :  { %v93_v15 = vadd.f32 %v293_v13, %v92_v14 }
  0x97   :  { %v97_v16 = vpack.c.bf16 %v93_v15, %v93_v15 }
  0x99   :  { %100 = vst.msk [vmem:[#allocation7] sm:$0xf] %vm99_vm1, %v97_v16 }
  0x9c   :  { %v94_v17 = vpop.f32.mrf.mxu0 }
  0x9d   :  { %v95_v18 = vadd.f32 %v293_v13, %v94_v17 }
  0x9f   :  { %v98_v19 = vpack.c.bf16 %v95_v18, %v95_v18 }
  0xa1   :  { %101 = vst.msk [vmem:[#allocation7 + $0x4] sm:$0xf] %vm99_vm1, %v98_v19 }
  0xa2   :  { %202 = dma.vmem_to_hbm [thread:$0]  %s195_s11, 128, %s197_s14, [#allocation4], %s423_s26, %s423_s26, %s424_s27  }
 0x10a   :  { %v137_v21 = vpop.f32.mrf.mxu1 }
 0x10b   :  { %v138_v22 = vadd.f32 %v137_v21, %v126_v20 }
 0x10d   :  { %v142_v23 = vpack.c.bf16 %v138_v22, %v138_v22 }
 0x10f   :  { %144 = vst.msk [vmem:[#allocation8] sm:$0xf] %vm99_vm1, %v142_v23  ;;  %v181_v25 = vpop.f32.mrf.mxu2 }
 0x110   :  { %v182_v26 = vadd.f32 %v181_v25, %v170_v24 }
 0x112   :  { %v139_v27 = vpop.f32.mrf.mxu1  ;;  %v186_v28 = vpack.c.bf16 %v182_v26, %v182_v26 }
 0x113   :  { %v140_v29 = vadd.f32 %v139_v27, %v126_v20 }
 0x114   :  { %188 = vst.msk [vmem:[#allocation10] sm:$0xf] %vm99_vm1, %v186_v28 }
 0x115   :  { %v143_v30 = vpack.c.bf16 %v140_v29, %v140_v29 }
 0x117   :  { %145 = vst.msk [vmem:[#allocation8 + $0x4] sm:$0xf] %vm99_vm1, %v143_v30  ;;  %v183_v31 = vpop.f32.mrf.mxu2 }
 0x118   :  { %215 = dma.vmem_to_hbm [thread:$0]  %s208_s3, 128, %s210_s17, [#allocation9], %s423_s26, %s423_s26, %s424_s27   ;;  %v184_v32 = vadd.f32 %v183_v31, %v170_v24 }
 0x11a   :  { %v187_v33 = vpack.c.bf16 %v184_v32, %v184_v32 }
 0x11c   :  { %189 = vst.msk [vmem:[#allocation10 + $0x4] sm:$0xf] %vm99_vm1, %v187_v33 }
 0x11d   :  { %228 = dma.vmem_to_hbm [thread:$0]  %s221_s19, 128, %s223_s22, [#allocation9], %s423_s26, %s423_s26, %s424_s27  }
 0x11e   :  { %418 = dma.done.wait [#allocation4], 128  }
 0x11f   :  { %419 = vsyncadd [#allocation4], 4294967168 }
 0x120   :  { %420 = dma.done.wait [#allocation9], 256  }
 0x121   :  { %421 = vsyncadd [#allocation9], 4294967040 }
 0x122   :  { %241 = vsyncpa [#allocation3], 1 }
 0x123   :  { %242 = vsyncpa [#allocation6], 1 }
 0x124   :  { %243 = vsyncpa [#allocation4], 1 }
 0x125   :  { %244 = vsyncpa [#allocation9], 1 }

</bundles_post_ra>
